<compile_context>
chip_gen: v7x
topology: tpu7x:2x2x1
jax: 0.10.0
libtpu: 0.0.40
codegen_flags: <defaults>
</compile_context>

<pallas_src>
import functools

import jax
import jax.numpy as jnp
from jax import lax
from jax.experimental import pallas as pl
from jax.experimental.pallas import tpu as pltpu


def _round_up(x, m):
    return ((x + m - 1) // m) * m


def _qmix_kernel(n_agents, embed_dim, state_dim,
                 x_ref,        # (tb, S+N+1) bf16/f32: [states | agent_qs | 1]
                 wcat_ref,     # (S+N+1, N*E+3E)       fused hypernet W (+bias row)
                 ones_ref,     # (1, E) f32            ones row for lane-dense reduce
                 v2w_ref,      # (1, E) f32            V[2] weight
                 v2b_ref,      # (1, 1) f32            V[2] bias
                 out_ref):     # (1, tb) f32
    ne = n_agents * embed_dim
    x = x_ref[...]

    # ONE fused hypernet matmul (bias folded in via the trailing 1.0 column of
    # x / last row of wcat): columns = [w1 | b1 | w_final | V0].
    h_all = jnp.dot(x, wcat_ref[...], preferred_element_type=jnp.float32)

    w1 = jnp.abs(h_all[:, :ne])                                    # (tb, N*E)
    b1 = h_all[:, ne:ne + embed_dim]                               # (tb, E)
    wf = jnp.abs(h_all[:, ne + embed_dim:ne + 2 * embed_dim])      # (tb, E)
    vh = jnp.maximum(h_all[:, ne + 2 * embed_dim:ne + 3 * embed_dim], 0.0)

    # hidden = elu( bmm(agent_qs[.,1,N], w1[.,N,E]) + b1 )
    qs = x[:, state_dim:state_dim + n_agents].astype(jnp.float32)  # (tb, N)
    hidden = b1
    for n in range(n_agents):
        hidden = hidden + qs[:, n:n + 1] * w1[:, n * embed_dim:(n + 1) * embed_dim]
    # ELU(alpha=1); exp argument clamped so padded / extreme rows stay finite.
    hidden = jnp.where(hidden > 0, hidden,
                       jnp.exp(jnp.minimum(hidden, 0.0)) - 1.0)

    # y[b] = sum_e hidden[b,e]*wf[b,e] + sum_e vh[b,e]*V2w[e] + V2b.
    # Emit lane-dense (1, tb) via an MXU contraction with the ones row
    # (ones[1,E] contracted with m[tb,E] on E -> (1, tb)); kept in f32.
    m = hidden * wf + vh * v2w_ref[...]                            # (tb, E)
    y = lax.dot_general(ones_ref[...], m,
                        dimension_numbers=(((1,), (1,)), ((), ())),
                        preferred_element_type=jnp.float32)        # (1, tb)
    out_ref[...] = y + v2b_ref[...]


def masked_qmixer_forward(agent_qs, states, params, *, tb=2048,
                          hypernet_matmul_dtype=jnp.bfloat16):
    """agent_qs: (bs, ep_len, n_agents); states: (bs, ep_len, state_dim)."""
    bs, ep_len, n_agents = agent_qs.shape
    state_dim = states.shape[-1]
    embed_dim = params["hyper_b_1_w"].shape[1]
    B = bs * ep_len

    # Batch tile: lane-dense multiple of 128, as large as useful, but capped
    # so the grid keeps >= 2 steps when the batch allows it (v7x: 2 TCs).
    B128 = _round_up(B, 128)
    tb = _round_up(max(tb, 128), 128)
    tb = min(tb, B128)
    if B128 >= 256:
        tb = min(tb, _round_up((B128 + 1) // 2, 128))
    B_pad = _round_up(B, tb)

    # Single (B, S+N+1) input slab: [states | agent_qs | 1.0]; the trailing
    # ones column folds the hypernet biases into the fused matmul.
    x = jnp.concatenate(
        [states.reshape(B, state_dim).astype(jnp.float32),
         agent_qs.reshape(B, n_agents).astype(jnp.float32),
         jnp.ones((B, 1), jnp.float32)], axis=1).astype(hypernet_matmul_dtype)
    if B_pad != B:
        x = jnp.pad(x, ((0, B_pad - B), (0, 0)))

    # Concatenated state-driven hypernet weights (+ zero rows for the qs
    # columns of x, + bias row) -> one matmul in-kernel.  Packed columns.
    w_state = jnp.concatenate(
        [params["hyper_w_1_w"], params["hyper_b_1_w"],
         params["hyper_w_final_w"], params["V0_w"]], axis=1).astype(jnp.float32)
    b_row = jnp.concatenate(
        [params["hyper_w_1_b"], params["hyper_b_1_b"],
         params["hyper_w_final_b"], params["V0_b"]], axis=0
    ).astype(jnp.float32)[None, :]
    wcat = jnp.concatenate(
        [w_state,
         jnp.zeros((n_agents, w_state.shape[1]), jnp.float32),  # agent_qs rows
         b_row], axis=0).astype(hypernet_matmul_dtype)

    ones_row = jnp.ones((1, embed_dim), jnp.float32)
    v2w = params["V2_w"].astype(jnp.float32).reshape(1, embed_dim)
    v2b = params["V2_b"].astype(jnp.float32).reshape(1, 1)

    kernel = functools.partial(_qmix_kernel, n_agents, embed_dim, state_dim)
    full = lambda a: pl.BlockSpec(a.shape, lambda i: (0,) * a.ndim)

    out = pl.pallas_call(
        kernel,
        out_shape=jax.ShapeDtypeStruct((1, B_pad), jnp.float32),
        grid_spec=pltpu.PrefetchScalarGridSpec(
            num_scalar_prefetch=0,
            grid=(B_pad // tb,),
            in_specs=[
                pl.BlockSpec((tb, state_dim + n_agents + 1), lambda i: (i, 0)),
                full(wcat), full(ones_row), full(v2w), full(v2b),
            ],
            out_specs=pl.BlockSpec((1, tb), lambda i: (0, i)),
        ),
        compiler_params=pltpu.CompilerParams(
            dimension_semantics=("parallel",),
            vmem_limit_bytes=32 * 1024 * 1024),
    )(x, wcat, ones_row, v2w, v2b)

    return out.reshape(-1)[:B].reshape(bs, ep_len, 1)


def _reference_forward(agent_qs, states, params, *, matmul_dtype=jnp.float32):
    """Pure-JAX reference.  matmul_dtype=bfloat16 mirrors the kernel numerics
    (bf16 hypernet-matmul operands; f32 accumulation and elementwise)."""
    bs, ep_len, n_agents = agent_qs.shape
    state_dim = states.shape[-1]
    embed_dim = params["hyper_b_1_w"].shape[1]
    f32 = jnp.float32

    def lin(xx, w, b):
        y = jnp.dot(xx.astype(matmul_dtype), w.astype(matmul_dtype),
                    preferred_element_type=f32,
                    precision=lax.Precision.HIGHEST)
        return y + b.astype(matmul_dtype).astype(f32)

    s = states.reshape(-1, state_dim).astype(f32)
    qs = agent_qs.reshape(-1, n_agents).astype(matmul_dtype).astype(f32)
    w1 = jnp.abs(lin(s, params["hyper_w_1_w"], params["hyper_w_1_b"]))
    w1 = w1.reshape(-1, n_agents, embed_dim)
    b1 = lin(s, params["hyper_b_1_w"], params["hyper_b_1_b"])
    hidden = jax.nn.elu(jnp.sum(qs[:, :, None] * w1, axis=1) + b1)      # (B,E)
    wf = jnp.abs(lin(s, params["hyper_w_final_w"], params["hyper_w_final_b"]))
    vh = jax.nn.relu(lin(s, params["V0_w"], params["V0_b"]))
    v = jnp.sum(vh * params["V2_w"].reshape(embed_dim), axis=-1) + params["V2_b"][0]
    y = jnp.sum(hidden * wf, axis=-1) + v
    return y.reshape(bs, ep_len, 1)


def init_params(key, state_dim, n_agents, embed_dim):
    ks = jax.random.split(key, 10)

    def lin(kw, kb, fan_in, fan_out):
        bound = 1.0 / jnp.sqrt(fan_in)
        w = jax.random.uniform(kw, (fan_in, fan_out), jnp.float32, -bound, bound)
        b = jax.random.uniform(kb, (fan_out,), jnp.float32, -bound, bound)
        return w, b

    p = {}
    p["hyper_w_1_w"], p["hyper_w_1_b"] = lin(ks[0], ks[1], state_dim, embed_dim * n_agents)
    p["hyper_w_final_w"], p["hyper_w_final_b"] = lin(ks[2], ks[3], state_dim, embed_dim)
    p["hyper_b_1_w"], p["hyper_b_1_b"] = lin(ks[4], ks[5], state_dim, embed_dim)
    p["V0_w"], p["V0_b"] = lin(ks[6], ks[7], state_dim, embed_dim)
    p["V2_w"], p["V2_b"] = lin(ks[8], ks[9], embed_dim, 1)
    return p


if __name__ == "__main__":
    bs, ep_len, n_agents = 2, 8, 4
    state_dim, embed_dim = 32, 32

    key = jax.random.PRNGKey(0)
    k_qs, k_st, k_p = jax.random.split(key, 3)
    agent_qs = jax.random.normal(k_qs, (bs, ep_len, n_agents), jnp.float32)
    states = jax.random.normal(k_st, (bs, ep_len, state_dim), jnp.float32)
    params = init_params(k_p, state_dim, n_agents, embed_dim)

    q_tot = masked_qmixer_forward(agent_qs, states, params)
    q_tot = jax.block_until_ready(q_tot)
    assert q_tot.shape == (bs, ep_len, 1)

    # Tight check against a reference that mirrors the kernel's bf16
    # hypernet-matmul numerics (f32 accumulation everywhere else).
    q_bf16 = _reference_forward(agent_qs, states, params,
                                matmul_dtype=jnp.bfloat16)
    assert jnp.allclose(q_tot, q_bf16, atol=5e-3, rtol=5e-3), (
        float(jnp.max(jnp.abs(q_tot - q_bf16))))

    # Loose sanity check against the full-f32 reference: bounds the bf16
    # operand-rounding error introduced by the hypernet matmul.
    q_f32 = _reference_forward(agent_qs, states, params,
                               matmul_dtype=jnp.float32)
    max_err = float(jnp.max(jnp.abs(q_tot - q_f32)))
    assert max_err <= 5e-2 * (1.0 + float(jnp.max(jnp.abs(q_f32)))), max_err

    print("KERNEL_OK")
</pallas_src>

<mosaic_0001>
module attributes {stable_mosaic.version = 11 : i64} {
  func.func @_qmix_kernel(%arg0: i32, %arg1: memref<128x37xbf16, #tpu.memory_space<vmem>>, %arg2: memref<37x224xbf16, #tpu.memory_space<vmem>>, %arg3: memref<1x32xf32, #tpu.memory_space<vmem>>, %arg4: memref<1x32xf32, #tpu.memory_space<vmem>>, %arg5: memref<1x1xf32, #tpu.memory_space<vmem>>, %arg6: memref<1x128xf32, #tpu.memory_space<vmem>>) attributes {dimension_semantics = [#tpu.dimension_semantics<parallel>], iteration_bounds = array<i64: 1>, scalar_prefetch = 0 : i64, scratch_operands = 0 : i64, tpu.core_type = #tpu.core_type<tc>, window_params = [{transform_indices = @transform_0, window_bounds = array<i64: 128, 37>}, {pipeline_mode = #tpu.pipeline_mode<synchronous>, transform_indices = @transform_1, window_bounds = array<i64: 37, 224>}, {pipeline_mode = #tpu.pipeline_mode<synchronous>, transform_indices = @transform_2, window_bounds = array<i64: 1, 32>}, {pipeline_mode = #tpu.pipeline_mode<synchronous>, transform_indices = @transform_3, window_bounds = array<i64: 1, 32>}, {pipeline_mode = #tpu.pipeline_mode<synchronous>, transform_indices = @transform_4, window_bounds = array<i64: 1, 1>}, {transform_indices = @transform_5, window_bounds = array<i64: 1, 128>}]} {
    %c0 = arith.constant 0 : index
    %c0_0 = arith.constant 0 : index
    %0 = vector.load %arg1[%c0, %c0_0] : memref<128x37xbf16, #tpu.memory_space<vmem>>, vector<128x37xbf16>
    %c0_1 = arith.constant 0 : index
    %c0_2 = arith.constant 0 : index
    %1 = vector.load %arg2[%c0_1, %c0_2] : memref<37x224xbf16, #tpu.memory_space<vmem>>, vector<37x224xbf16>
    %cst = arith.constant dense<0.000000e+00> : vector<128x224xf32>
    %2 = tpu.matmul %0, %1, %cst {dimension_numbers = #tpu.dot_dimension_numbers<[1], [0], [0], [1], [0, 0, 1, 1], [], []>} : vector<128x37xbf16>, vector<37x224xbf16>, vector<128x224xf32> -> vector<128x224xf32>
    %3 = vector.extract_strided_slice %2 {offsets = [0, 0], sizes = [128, 128], strides = [1, 1]} : vector<128x224xf32> to vector<128x128xf32>
    %4 = math.absf %3 : vector<128x128xf32>
    %5 = vector.extract_strided_slice %2 {offsets = [0, 128], sizes = [128, 32], strides = [1, 1]} : vector<128x224xf32> to vector<128x32xf32>
    %6 = vector.extract_strided_slice %2 {offsets = [0, 160], sizes = [128, 32], strides = [1, 1]} : vector<128x224xf32> to vector<128x32xf32>
    %7 = math.absf %6 : vector<128x32xf32>
    %8 = vector.extract_strided_slice %2 {offsets = [0, 192], sizes = [128, 32], strides = [1, 1]} : vector<128x224xf32> to vector<128x32xf32>
    %cst_3 = arith.constant 0.000000e+00 : f32
    %9 = vector.broadcast %cst_3 : f32 to vector<128x32xf32>
    %10 = arith.maximumf %8, %9 : vector<128x32xf32>
    %11 = vector.extract_strided_slice %0 {offsets = [0, 32], sizes = [128, 4], strides = [1, 1]} : vector<128x37xbf16> to vector<128x4xbf16>
    %12 = arith.extf %11 : vector<128x4xbf16> to vector<128x4xf32>
    %13 = vector.extract_strided_slice %12 {offsets = [0, 0], sizes = [128, 1], strides = [1, 1]} : vector<128x4xf32> to vector<128x1xf32>
    %14 = vector.extract_strided_slice %4 {offsets = [0, 0], sizes = [128, 32], strides = [1, 1]} : vector<128x128xf32> to vector<128x32xf32>
    %15 = vector.broadcast %13 : vector<128x1xf32> to vector<128x32xf32>
    %16 = arith.mulf %15, %14 : vector<128x32xf32>
    %17 = arith.addf %5, %16 : vector<128x32xf32>
    %18 = vector.extract_strided_slice %12 {offsets = [0, 1], sizes = [128, 1], strides = [1, 1]} : vector<128x4xf32> to vector<128x1xf32>
    %19 = vector.extract_strided_slice %4 {offsets = [0, 32], sizes = [128, 32], strides = [1, 1]} : vector<128x128xf32> to vector<128x32xf32>
    %20 = vector.broadcast %18 : vector<128x1xf32> to vector<128x32xf32>
    %21 = arith.mulf %20, %19 : vector<128x32xf32>
    %22 = arith.addf %17, %21 : vector<128x32xf32>
    %23 = vector.extract_strided_slice %12 {offsets = [0, 2], sizes = [128, 1], strides = [1, 1]} : vector<128x4xf32> to vector<128x1xf32>
    %24 = vector.extract_strided_slice %4 {offsets = [0, 64], sizes = [128, 32], strides = [1, 1]} : vector<128x128xf32> to vector<128x32xf32>
    %25 = vector.broadcast %23 : vector<128x1xf32> to vector<128x32xf32>
    %26 = arith.mulf %25, %24 : vector<128x32xf32>
    %27 = arith.addf %22, %26 : vector<128x32xf32>
    %28 = vector.extract_strided_slice %12 {offsets = [0, 3], sizes = [128, 1], strides = [1, 1]} : vector<128x4xf32> to vector<128x1xf32>
    %29 = vector.extract_strided_slice %4 {offsets = [0, 96], sizes = [128, 32], strides = [1, 1]} : vector<128x128xf32> to vector<128x32xf32>
    %30 = vector.broadcast %28 : vector<128x1xf32> to vector<128x32xf32>
    %31 = arith.mulf %30, %29 : vector<128x32xf32>
    %32 = arith.addf %27, %31 : vector<128x32xf32>
    %cst_4 = arith.constant 0.000000e+00 : f32
    %33 = vector.broadcast %cst_4 : f32 to vector<128x32xf32>
    %34 = arith.cmpf ogt, %32, %33 : vector<128x32xf32>
    %cst_5 = arith.constant 0.000000e+00 : f32
    %35 = vector.broadcast %cst_5 : f32 to vector<128x32xf32>
    %36 = arith.minimumf %32, %35 : vector<128x32xf32>
    %37 = math.exp %36 : vector<128x32xf32>
    %cst_6 = arith.constant 1.000000e+00 : f32
    %38 = vector.broadcast %cst_6 : f32 to vector<128x32xf32>
    %39 = arith.subf %37, %38 : vector<128x32xf32>
    %40 = arith.select %34, %32, %39 : vector<128x32xi1>, vector<128x32xf32>
    %41 = arith.mulf %40, %7 : vector<128x32xf32>
    %c0_7 = arith.constant 0 : index
    %c0_8 = arith.constant 0 : index
    %42 = vector.load %arg4[%c0_7, %c0_8] : memref<1x32xf32, #tpu.memory_space<vmem>>, vector<1x32xf32>
    %43 = vector.broadcast %42 : vector<1x32xf32> to vector<128x32xf32>
    %44 = arith.mulf %10, %43 : vector<128x32xf32>
    %45 = arith.addf %41, %44 : vector<128x32xf32>
    %c0_9 = arith.constant 0 : index
    %c0_10 = arith.constant 0 : index
    %46 = vector.load %arg3[%c0_9, %c0_10] : memref<1x32xf32, #tpu.memory_space<vmem>>, vector<1x32xf32>
    %cst_11 = arith.constant dense<0.000000e+00> : vector<1x128xf32>
    %47 = tpu.matmul %46, %45, %cst_11 {dimension_numbers = #tpu.dot_dimension_numbers<[1], [1], [0], [0], [0, 0, 1, 0], [], []>} : vector<1x32xf32>, vector<128x32xf32>, vector<1x128xf32> -> vector<1x128xf32>
    %c0_12 = arith.constant 0 : index
    %c0_13 = arith.constant 0 : index
    %48 = vector.load %arg5[%c0_12, %c0_13] : memref<1x1xf32, #tpu.memory_space<vmem>>, vector<1x1xf32>
    %49 = vector.broadcast %48 : vector<1x1xf32> to vector<1x128xf32>
    %50 = arith.addf %47, %49 : vector<1x128xf32>
    %c0_14 = arith.constant 0 : index
    %c0_15 = arith.constant 0 : index
    %51 = vector.load %arg6[%c0_14, %c0_15] : memref<1x128xf32, #tpu.memory_space<vmem>>, vector<1x128xf32>
    tpu.vector_store %arg6[%c0_14, %c0_15], %50 {strides = array<i32>} : memref<1x128xf32, #tpu.memory_space<vmem>>, vector<1x128xf32>,
    return
  }
  func.func @transform_0(%arg0: i32) -> (i32, i32) {
    %c0_i32 = arith.constant 0 : i32
    %c0_i32_0 = arith.constant 0 : i32
    return %arg0, %c0_i32 : i32, i32
  }
  func.func @transform_1(%arg0: i32) -> (i32, i32) {
    %c0_i32 = arith.constant 0 : i32
    %c0_i32_0 = arith.constant 0 : i32
    %c0_i32_1 = arith.constant 0 : i32
    return %c0_i32, %c0_i32_0 : i32, i32
  }
  func.func @transform_2(%arg0: i32) -> (i32, i32) {
    %c0_i32 = arith.constant 0 : i32
    %c0_i32_0 = arith.constant 0 : i32
    %c0_i32_1 = arith.constant 0 : i32
    return %c0_i32, %c0_i32_0 : i32, i32
  }
  func.func @transform_3(%arg0: i32) -> (i32, i32) {
    %c0_i32 = arith.constant 0 : i32
    %c0_i32_0 = arith.constant 0 : i32
    %c0_i32_1 = arith.constant 0 : i32
    return %c0_i32, %c0_i32_0 : i32, i32
  }
  func.func @transform_4(%arg0: i32) -> (i32, i32) {
    %c0_i32 = arith.constant 0 : i32
    %c0_i32_0 = arith.constant 0 : i32
    %c0_i32_1 = arith.constant 0 : i32
    return %c0_i32, %c0_i32_0 : i32, i32
  }
  func.func @transform_5(%arg0: i32) -> (i32, i32) {
    %c0_i32 = arith.constant 0 : i32
    %c0_i32_0 = arith.constant 0 : i32
    return %c0_i32, %arg0 : i32, i32
  }
}

</mosaic_0001>

<bundles_post_ra>
// kernel: tpu_custom_call.1
= control target key start
LH: loop header
LB: loop body
LE: loop exit
PB: predicated region body
PF: predicated region fallthrough
CT: control target
= control target key end

     0   :  { %s2402_s0 = inlined_call_operand.vmem [shape: bf16[128,37], index: 0, kind: input, shape index: {}]   ;;  %s2403_s1 = inlined_call_operand.vmem [shape: bf16[37,224], index: 1, kind: input, shape index: {}]   ;;  %s2404_s2 = inlined_call_operand.vmem [shape: f32[1,32], index: 2, kind: input, shape index: {}]   ;;  %s2405_s3 = inlined_call_operand.vmem [shape: f32[1,32], index: 3, kind: input, shape index: {}]   ;;  %s2406_s4 = inlined_call_operand.<no memory space> [shape: f32[1,1], index: 4, kind: input, shape index: {}]   ;;  %s2407_s5 = inlined_call_operand.hbm [shape: f32[1,128], index: 5, kind: output, shape index: {}]  }
   0x1   :  { %v10_v0 = vstv %s2406_s4 }
   0x2   :  { %11 = vst [vmem:[#allocation2] sm:$0x1] %v10_v0 }
   0x3   :  { %v1678_v1 = vld [vmem:[%s2403_s1 + $0x4] ss:$8 sps:$4 sm:$0xff]   ;;  %vm135_vm0 = vcmask 1041408   ;;  %vm136_vm1 = vcmask 1042432   ;;  %v1680_v2 = vld [vmem:[%s2403_s1] ss:$8 sps:$4 sm:$0xff]  }
   0x4   :  { %145 = vmatprep.subr.bf16.mxu0 %v1678_v1  ;;  %v1681_v3 = vld [vmem:[%s2403_s1 + $0x14] ss:$8 sps:$4 sm:$0xff]   ;;  %v44_v4 = vld [vmem:[%s2403_s1 + $0x20] sm:$0x77]  ;;  %v1758_v5 = vmov 0   ;;  %v1759_v8 = vmov 65535  }
   0x5   :  { %177 = vmatprep.mubr.bf16.mxu0 %v1758_v5  ;;  %146 = vmatpush1.bf16.msra.mxu0 %v1680_v2  ;;  %v1683_v6 = vld [vmem:[%s2403_s1 + $0x10] ss:$8 sps:$4 sm:$0xff]   ;;  %v1356_v7 = vcombine.high %v44_v4, %v44_v4  ;;  %v137_v9 = vsel %vm135_vm0, 4294967295, %v1759_v8  ;;  %v1355_v10 = vcombine.low %v44_v4, %v44_v4  ;;  %v24_v13 = vld [vmem:[%s2402_s0] sm:$0xff]  }
   0x6   :  { %147 = vmatprep.subr.bf16.mxu0 %v1681_v3  ;;  %v138_v11 = vsel %vm136_vm1, %v137_v9, 0  ;;  %v306_v14 = vunpack.c.l.bf16 %v24_v13 }
   0x7   :  { %v143_v12 = vand.u32 %v1356_v7, %v138_v11 }
   0x8   :  { %12 = vsyncpa [#allocation4], 0  ;;  %v140_v15 = vand.u32 %v1355_v10, %v138_v11  ;;  %v26_v16 = vld [vmem:[%s2402_s0 + $0x8] sm:$0xff]   ;;  %v1760_v17 = vmov 35   ;;  %v307_v18 = vunpack.c.h.bf16 %v24_v13  ;;  %v28_v21 = vld [vmem:[%s2402_s0 + $0x10] sm:$0xff]   ;;  %vm110_vm2 = vcmask 302080  }
   0x9   :  { %148 = vmatpush1.bf16.msra.mxu0 %v1683_v6  ;;  %1496 = vset.pattern.permute.xlu1 %v1760_v17  ;;  %v308_v19 = vunpack.c.l.bf16 %v26_v16  ;;  %v309_v20 = vunpack.c.h.bf16 %v26_v16  ;;  %v310_v23 = vunpack.c.l.bf16 %v28_v21  ;;  %v311_v24 = vunpack.c.h.bf16 %v28_v21  ;;  %v32_v28 = vld [vmem:[%s2402_s0 + $0x20] sm:$0xff]   ;;  %v34_v32 = vld [vmem:[%s2402_s0 + $0x28] sm:$0xff]   ;;  %s1763_s15 = smov 64   ;;  %v30_v38 = vld [vmem:[%s2402_s0 + $0x18] sm:$0xff]   ;;  %s1766_s21 = smov 32  }
   0xa   :  { %149 = vmatprep.subr.bf16.mxu0 %v143_v12  ;;  %1514 = vset.pattern.permute.xlu0 %v1760_v17  ;;  %v1831_v22 = vpack.i.bf16 %v307_v18, %v306_v14  ;;  %v1761_v27 = vmov 33   ;;  %v314_v29 = vunpack.c.l.bf16 %v32_v28  ;;  %v315_v30 = vunpack.c.h.bf16 %v32_v28  ;;  %v1381_v31 = vld [vmem:[%s2405_s3] ss:$0 sm:$0xff]  ;;  %v36_v42 = vld [vmem:[%s2402_s0 + $0x30] sm:$0xff]   ;;  %v38_v46 = vld [vmem:[%s2402_s0 + $0x38] sm:$0xff]   ;;  %s1765_s0 = smov 96  }
   0xb   :  { %v1833_v25 = vpack.i.bf16 %v309_v20, %v308_v19  ;;  %v1837_v26 = vpack.i.bf16 %v311_v24, %v310_v23  ;;  %v1762_v33 = vmov 34   ;;  %v316_v34 = vunpack.c.l.bf16 %v34_v32  ;;  %s1770_s24 = smov [#allocation3]  }
   0xc   :  { %1498 = vperm.xlu1 %1496, %v1831_v22   ;;  %v317_v35 = vunpack.c.h.bf16 %v34_v32  ;;  %v1561_v36 = vpack.i.bf16 %v315_v30, %v314_v29  ;;  %v312_v39 = vunpack.c.l.bf16 %v30_v38  ;;  %v313_v40 = vunpack.c.h.bf16 %v30_v38  ;;  %s1335_s25 = sshll.u32 %s1770_s24, 4  ;;  %s1336_s25 = int_to_ptr.vmem [resolvable:$true] %s1335_s25 }
   0xd   :  { %150 = vmatpush1.bf16.msra.mxu0 %v140_v15  ;;  %1516 = vperm.xlu0 %1514, %v1833_v25   ;;  %v318_v43 = vunpack.c.l.bf16 %v36_v42  ;;  %v319_v44 = vunpack.c.h.bf16 %v36_v42  ;;  %v320_v47 = vunpack.c.l.bf16 %v38_v46  ;;  %v321_v48 = vunpack.c.h.bf16 %v38_v46  ;;  %s1734_s26 = scalar_lea.vmem %s1336_s25, 16  ;;  %s1738_s27 = scalar_lea.vmem %s1336_s25, 32 }
   0xe   :  { %v1858_v37 = vpack.i.bf16 %v317_v35, %v316_v34  ;;  %v1538_v41 = vpack.i.bf16 %v313_v40, %v312_v39  ;;  %v1764_v50 = vmov 32   ;;  %vm1768_vm4 = vmmov 0   ;;  %p1735_p0 = scmp.ne.s32.totalorder %s1336_s25, %s1734_s26  ;;  %p1739_p1 = scmp.lt.s32.totalorder %s1336_s25, %s1336_s25 }
   0xf   :  { %v1600_v45 = vpack.i.bf16 %v319_v44, %v318_v43  ;;  %v1623_v49 = vpack.i.bf16 %v321_v48, %v320_v47  ;;  %vm1206_vm6 = vcmask 261120   ;;  %p1740_p2 = scmp.lt.s32.totalorder %s1738_s27, %s1734_s26 }
  0x10   :  { %1357 = vmatmul.mubr.msk.bf16.vlgmr.msra.gmra.mrb[0].mxu0 %vm110_vm2, %v24_v13  ;;  %1502 = vset.pattern.permute.xlu1 %v1761_v27  ;;  %vm2319_vm7 = vmpackc.low %vm1206_vm6, %vm1206_vm6 }
  0x11   :  { %187 = vmatprep.mubr.bf16.mxu0 %v1758_v5  ;;  %1504 = vperm.xlu1 %1502, %v1833_v25   ;;  %p1741_p3 = por %p1740_p2, %p1739_p1 }
  0x12   :  { %1533 = vperm.xlu0 %1514, %v1837_v26  }
  0x13   :  { %p1742_p4 = pnand %p1741_p3, %p1735_p0 }
  0x15   :  { %1508 = vset.pattern.permute.xlu1 %v1762_v33 }
  0x16   :  { %1096 = vrot.lane.b32.xlu0 %v1381_v31, %s1763_s15  ;;  %1510 = vperm.xlu1 %1508, %v1833_v25  }
  0x18   :  { %1358 = vmatmul.mubr.msk.bf16.gmra.mrb[4].mxu0 %vm110_vm2, %v26_v16 }
  0x19   :  { %197 = vmatprep.mubr.bf16.mxu0 %v1758_v5 }
  0x1a   :  { %1562 = vperm.xlu0 %1514, %v1561_v36   ;;  %1520 = vset.pattern.permute.xlu1 %v1761_v27 }
  0x1b   :  { %1522 = vperm.xlu1 %1520, %v1837_v26  }
  0x1e   :  { %1579 = vperm.xlu0 %1514, %v1858_v37  }
  0x1f   :  { %1526 = vset.pattern.permute.xlu1 %v1762_v33 }
  0x20   :  { %1359 = vmatmul.mubr.msk.bf16.gmra.mrb[8].mxu0 %vm110_vm2, %v28_v21  ;;  %1528 = vperm.xlu1 %1526, %v1837_v26  }
  0x21   :  { %207 = vmatprep.mubr.bf16.mxu0 %v1758_v5 }
  0x22   :  { %1583 = vset.pattern.permute.xlu0 %v1762_v33 }
  0x23   :  { %1585 = vperm.xlu0 %1583, %v1831_v22  }
  0x24   :  { %1537 = vset.pattern.permute.xlu1 %v1761_v27 }
  0x25   :  { %1539 = vperm.xlu1 %1537, %v1538_v41  }
  0x27   :  { %1590 = vperm.xlu0 %1583, %v1538_v41  }
  0x28   :  { %1360 = vmatmul.mubr.msk.bf16.gmra.mrb[12].mxu0 %vm110_vm2, %v30_v38 }
  0x29   :  { %217 = vmatprep.mubr.bf16.mxu0 %v1758_v5  ;;  %1543 = vset.pattern.permute.xlu1 %v1760_v17 }
  0x2a   :  { %1545 = vperm.xlu1 %1543, %v1538_v41  }
  0x2b   :  { %1601 = vperm.xlu0 %1583, %v1600_v45  }
  0x2e   :  { %1549 = vset.pattern.permute.xlu1 %v1761_v27 }
  0x2f   :  { %1605 = vset.pattern.permute.xlu0 %v1761_v27  ;;  %1551 = vperm.xlu1 %1549, %v1561_v36  }
  0x30   :  { %1361 = vmatmul.mubr.msk.bf16.gmra.mrb[16].mxu0 %vm110_vm2, %v32_v28  ;;  %1607 = vperm.xlu0 %1605, %v1831_v22  }
  0x31   :  { %227 = vmatprep.mubr.bf16.mxu0 %v1758_v5 }
  0x33   :  { %1555 = vset.pattern.permute.xlu1 %v1762_v33 }
  0x34   :  { %1557 = vperm.xlu1 %1555, %v1561_v36   ;;  %1624 = vperm.xlu0 %1605, %v1623_v49  }
  0x38   :  { %1362 = vmatmul.mubr.msk.bf16.gmra.mrb[20].mxu0 %vm110_vm2, %v34_v32  ;;  %1566 = vset.pattern.permute.xlu1 %v1761_v27 }
  0x39   :  { %237 = vmatprep.mubr.bf16.mxu0 %v1758_v5  ;;  %1568 = vperm.xlu1 %1566, %v1858_v37  }
  0x3a   :  { %1640 = vset.pattern.permute.xlu0 %v1764_v50 }
  0x3b   :  { %1642 = vperm.xlu0 %1640, %v1833_v25  }
  0x3d   :  { %1572 = vset.pattern.permute.xlu1 %v1762_v33 }
  0x3e   :  { %1574 = vperm.xlu1 %1572, %v1858_v37  }
  0x3f   :  { %1647 = vperm.xlu0 %1640, %v1837_v26  }
  0x40   :  { %1363 = vmatmul.mubr.msk.bf16.gmra.mrb[24].mxu0 %vm110_vm2, %v36_v42 }
  0x41   :  { %247 = vmatprep.mubr.bf16.mxu0 %v1758_v5 }
  0x42   :  { %1594 = vset.pattern.permute.xlu1 %v1761_v27 }
  0x43   :  { %1658 = vperm.xlu0 %1640, %v1561_v36   ;;  %1596 = vperm.xlu1 %1594, %v1600_v45  }
  0x47   :  { %1668 = vperm.xlu0 %1640, %v1600_v45   ;;  %1611 = vset.pattern.permute.xlu1 %v1760_v17 }
  0x48   :  { %1364 = vmatmul.mubr.msk.bf16.gmra.mrb[28].mxu0 %vm110_vm2, %v38_v46  ;;  %1613 = vperm.xlu1 %1611, %v1600_v45  }
  0x4b   :  { %1677 = vset.pattern.permute.xlu0 %v1758_v5 }
  0x4c   :  { %1617 = vset.pattern.permute.xlu1 %v1764_v50 }
  0x4d   :  { %1619 = vperm.xlu1 %1617, %v1831_v22  }
  0x51   :  { %1628 = vset.pattern.permute.xlu1 %v1762_v33 }
  0x52   :  { %1630 = vperm.xlu1 %1628, %v1623_v49  }
  0x56   :  { %1634 = vset.pattern.permute.xlu1 %v1760_v17 }
  0x57   :  { %1636 = vperm.xlu1 %1634, %v1623_v49  }
  0x5b   :  { %1651 = vset.pattern.permute.xlu1 %v1764_v50 }
  0x5c   :  { %1653 = vperm.xlu1 %1651, %v1538_v41  }
  0x60   :  { %1663 = vperm.xlu1 %1651, %v1858_v37  }
  0x64   :  { %1673 = vperm.xlu1 %1651, %v1623_v49  }
  0x8b   :  { %v1906_v51 = vpop.permute.xlu1 %1498 }
  0x8c   :  { %v1918_v57 = vpop.permute.xlu0 %1516  ;;  %v1500_v20 = vunpack.i.l.bf16 %v1906_v51 }
  0x90   :  { %v1908_v52 = vpop.permute.xlu1 %1504 }
  0x91   :  { %v1922_v59 = vpop.permute.xlu0 %1533 }
  0x95   :  { %v1910_v53 = vpop.permute.xlu1 %1510  ;;  %v1926_v61 = vpop.permute.xlu0 %1096 }
  0x99   :  { %v1930_v63 = vpop.permute.xlu0 %1562 }
  0x9a   :  { %v1912_v54 = vpop.permute.xlu1 %1522 }
  0x9d   :  { %v1934_v1 = vpop.permute.xlu0 %1579 }
  0x9f   :  { %v1914_v55 = vpop.permute.xlu1 %1528 }
  0xa2   :  { %v1936_v2 = vpop.permute.xlu0 %1585 }
  0xa3   :  { %v1587_v13 = vunpack.i.l.bf16 %v1936_v2 }
  0xa4   :  { %v1916_v56 = vpop.permute.xlu1 %1539 }
  0xa6   :  { %v1940_v4 = vpop.permute.xlu0 %1590 }
  0xa9   :  { %v1920_v58 = vpop.permute.xlu1 %1545 }
  0xaa   :  { %v1944_v6 = vpop.permute.xlu0 %1601 }
  0xae   :  { %v1924_v60 = vpop.permute.xlu1 %1551 }
  0xaf   :  { %v1608_v8 = vpop.permute.xlu0 %1607 }
  0xb0   :  { %v1609_v17 = vunpack.i.l.bf16 %v1608_v8  ;;  %v1610_v38 = vunpack.i.h.bf16 %v1608_v8 }
  0xb3   :  { %v1928_v62 = vpop.permute.xlu1 %1557  ;;  %v1948_v12 = vpop.permute.xlu0 %1624 }
  0xb8   :  { %v1932_v0 = vpop.permute.xlu1 %1568 }
  0xba   :  { %v1643_v24 = vpop.permute.xlu0 %1642 }
  0xbb   :  { %v1644_v31 = vunpack.i.l.bf16 %v1643_v24  ;;  %v1645_v37 = vunpack.i.h.bf16 %v1643_v24 }
  0xbd   :  { %v1938_v3 = vpop.permute.xlu1 %1574 }
  0xbe   :  { %v1648_v46 = vpop.permute.xlu0 %1647 }
  0xc2   :  { %v1942_v5 = vpop.permute.xlu1 %1596 }
  0xc7   :  { %v1946_v7 = vpop.permute.xlu1 %1613 }
  0xcc   :  { %v1620_v9 = vpop.permute.xlu1 %1619 }
  0xcd   :  { %v1621_v10 = vunpack.i.l.bf16 %v1620_v9  ;;  %v1622_v14 = vunpack.i.h.bf16 %v1620_v9  ;;  %v1649_v9 = vunpack.i.l.bf16 %v1648_v46 }
  0xd1   :  { %v1959_v34 = vpop.permute.xlu1 %1630 }
  0xd6   :  { %v1973_v49 = vpop.permute.xlu1 %1636 }
  0xe3   :  { %v179_v11 = vpop.f32.mrb[0].mxu0 }
  0xe4   :  { %v258_v15 = vand.u32 2147483647, %v179_v11  ;;  %v181_v16 = vpop.f32.mrb[1].mxu0  ;;  %v1588_v11 = vunpack.i.h.bf16 %v1936_v2 }
  0xe5   :  { %v274_v18 = vand.u32 2147483647, %v181_v16  ;;  %v183_v19 = vpop.f32.mrb[2].mxu0  ;;  %v290_v27 = vmax.f32 %v181_v16, 0.0 }
  0xe6   :  { %v259_v21 = vand.u32 2147483647, %v183_v19  ;;  %v185_v22 = vpop.f32.mrb[3].mxu0  ;;  %v658_v23 = vmul.f32 %v1587_v13, %v258_v15  ;;  %v402_v25 = vmul.f32 %v1621_v10, %v258_v15  ;;  %v498_v28 = vmul.f32 %v1609_v17, %v258_v15 }
  0xe7   :  { %1026 = vrot.lane.b32.xlu1 %v274_v18, %s1765_s0  ;;  %v818_v30 = vmul.f32 %v1500_v20, %v258_v15  ;;  %v1099_v40 = vmul.f32 %v1926_v61, %v290_v27  ;;  %v275_v41 = vand.u32 2147483647, %v185_v22  ;;  %v291_v42 = vmax.f32 %v185_v22, 0.0 }
  0xe8   :  { %690 = vrot.lane.b32.xlu0 %v658_v23, %s1763_s15  ;;  %v403_v26 = vmul.f32 %v1622_v14, %v259_v21  ;;  %v1954_v29 = vadd.f32 %v402_v25, %v181_v16  ;;  %v499_v48 = vmul.f32 %v1610_v38, %v259_v21  ;;  %v1650_v17 = vunpack.i.h.bf16 %v1648_v46 }
  0xe9   :  { %v1100_v8 = vmul.f32 %v1926_v61, %v291_v42  ;;  %v1501_v18 = vunpack.i.h.bf16 %v1906_v51  ;;  %v659_v20 = vmul.f32 %v1588_v11, %v259_v21  ;;  %v1506_v25 = vunpack.i.l.bf16 %v1908_v52 }
  0xea   :  { %v1956_v32 = vadd.f32 %v403_v26, %v185_v22  ;;  %v1654_v26 = vpop.permute.xlu1 %1653  ;;  %v1512_v42 = vunpack.i.l.bf16 %v1910_v53 }
  0xeb   :  { %530 = vrot.lane.b32.xlu1 %v498_v28, %s1765_s0  ;;  %v189_v33 = vpop.f32.mrb[4].mxu0  ;;  %v819_v28 = vmul.f32 %v1501_v18, %v259_v21 }
  0xec   :  { %v1961_v35 = vand.u32 2147483647, %v189_v33  ;;  %850 = vrot.lane.b32.xlu0 %v818_v30, %s1766_s21  ;;  %v191_v36 = vpop.f32.mrb[5].mxu0  ;;  %v1507_v30 = vunpack.i.h.bf16 %v1908_v52  ;;  %v1655_v33 = vunpack.i.l.bf16 %v1654_v26  ;;  %v1656_v52 = vunpack.i.h.bf16 %v1654_v26 }
  0xed   :  { %v193_v39 = vpop.f32.mrb[6].mxu0  ;;  %v276_v14 = vand.u32 2147483647, %v191_v36  ;;  %v292_v22 = vmax.f32 %v191_v36, 0.0  ;;  %v1524_v26 = vunpack.i.l.bf16 %v1912_v54 }
  0xee   :  { %v1965_v43 = vand.u32 2147483647, %v193_v39  ;;  %v1967_v44 = vpop.f32.mrb[7].mxu0  ;;  %v404_v45 = vmul.f32 %v1644_v31, %v1961_v35  ;;  %v500_v38 = vmul.f32 %v1506_v25, %v1961_v35  ;;  %v1592_v39 = vunpack.i.l.bf16 %v1940_v4 }
  0xef   :  { %1131 = vrot.lane.b32.xlu1 %v1099_v40, %s1763_s15  ;;  %v1101_v31 = vmul.f32 %v1926_v61, %v292_v22  ;;  %v1518_v22 = vunpack.i.l.bf16 %v1918_v57  ;;  %v1519_v25 = vunpack.i.h.bf16 %v1918_v57 }
  0xf0   :  { %1028 = vrot.lane.b32.xlu0 %v275_v41, %s1765_s0  ;;  %v405_v47 = vmul.f32 %v1645_v37, %v1965_v43  ;;  %v1975_v50 = vadd.f32 %v404_v45, %v191_v36  ;;  %v1513_v41 = vunpack.i.h.bf16 %v1910_v53  ;;  %v1593_v45 = vunpack.i.h.bf16 %v1940_v4 }
  0xf2   :  { %v1979_v10 = vadd.f32 %v405_v47, %v1967_v44  ;;  %v661_v18 = vmul.f32 %v1513_v41, %v1965_v43  ;;  %v1530_v41 = vunpack.i.l.bf16 %v1914_v55 }
  0xf3   :  { %532 = vrot.lane.b32.xlu1 %v499_v48, %s1765_s0  ;;  %v199_v13 = vpop.f32.mrb[8].mxu0 }
  0xf4   :  { %v1983_v15 = vand.u32 2147483647, %v199_v13  ;;  %1133 = vrot.lane.b32.xlu0 %v1100_v8, %s1763_s15  ;;  %v1986_v16 = vpop.f32.mrb[9].mxu0  ;;  %v501_v8 = vmul.f32 %v1507_v30, %v1965_v43  ;;  %v1659_v13 = vpop.permute.xlu0 %1658 }
  0xf5   :  { %v203_v19 = vpop.f32.mrb[10].mxu0  ;;  %v1661_v30 = vunpack.i.h.bf16 %v1659_v13 }
  0xf6   :  { %v1989_v23 = vand.u32 2147483647, %v203_v19  ;;  %v1991_v24 = vpop.f32.mrb[11].mxu0  ;;  %v406_v2 = vmul.f32 %v1649_v9, %v1983_v15  ;;  %v1660_v19 = vunpack.i.l.bf16 %v1659_v13 }
  0xf7   :  { %692 = vrot.lane.b32.xlu1 %v659_v20, %s1763_s15 }
  0xf8   :  { %1030 = vrot.lane.b32.xlu0 %v276_v14, %s1765_s0  ;;  %v407_v27 = vmul.f32 %v1650_v17, %v1989_v23  ;;  %v1999_v51 = vadd.f32 %v406_v2, %v1986_v16  ;;  %v660_v14 = vmul.f32 %v1512_v42, %v1961_v35  ;;  %v502_v42 = vmul.f32 %v1524_v26, %v1983_v15 }
  0xfa   :  { %v2004_v36 = vadd.f32 %v407_v27, %v1991_v24 }
  0xfb   :  { %852 = vrot.lane.b32.xlu1 %v819_v28, %s1766_s21  ;;  %v209_v37 = vpop.f32.mrb[12].mxu0 }
  0xfc   :  { %v2009_v40 = vand.u32 2147483647, %v209_v37  ;;  %1135 = vrot.lane.b32.xlu0 %v1101_v31, %s1763_s15  ;;  %v2012_v21 = vpop.f32.mrb[13].mxu0 }
  0xfd   :  { %v213_v46 = vpop.f32.mrb[14].mxu0 }
  0xfe   :  { %v2017_v47 = vand.u32 2147483647, %v213_v46  ;;  %v2019_v48 = vpop.f32.mrb[15].mxu0  ;;  %v408_v9 = vmul.f32 %v1655_v33, %v2009_v40  ;;  %v2024_v11 = vmul.f32 %v1592_v39, %v2009_v40  ;;  %v820_v33 = vmul.f32 %v1518_v22, %v1961_v35 }
  0xff   :  { %534 = vrot.lane.b32.xlu1 %v500_v38, %s1765_s0  ;;  %v821_v39 = vmul.f32 %v1519_v25, %v1965_v43  ;;  %v277_v35 = vand.u32 2147483647, %v1967_v44  ;;  %v293_v46 = vmax.f32 %v1967_v44, 0.0  ;;  %v662_v44 = vmul.f32 %v1530_v41, %v1983_v15 }
 0x100   :  { %536 = vrot.lane.b32.xlu0 %v501_v8, %s1765_s0  ;;  %v409_v53 = vmul.f32 %v1656_v52, %v2017_v47  ;;  %v2030_v4 = vmul.f32 %v1593_v45, %v2017_v47  ;;  %v2034_v17 = vadd.f32 %v408_v9, %v2012_v21  ;;  %v1664_v52 = vpop.permute.xlu1 %1663  ;;  %v2408_v9 = vmov 0.0|0.0  }
 0x101   :  { %v1665_v43 = vunpack.i.l.bf16 %v1664_v52  ;;  %1451 = vmatprep.subr.bf16.mxu1 %v2408_v9 }
 0x102   :  { %v2038_v20 = vadd.f32 %v409_v53, %v2019_v48 }
 0x103   :  { %694 = vrot.lane.b32.xlu1 %v660_v14, %s1763_s15  ;;  %v219_v2 = vpop.f32.mrb[16].mxu0 }
 0x104   :  { %v2044_v27 = vand.u32 2147483647, %v219_v2  ;;  %696 = vrot.lane.b32.xlu0 %v661_v18, %s1763_s15  ;;  %v2047_v28 = vpop.f32.mrb[17].mxu0  ;;  %v1102_v2 = vmul.f32 %v1926_v61, %v293_v46 }
 0x105   :  { %v223_v31 = vpop.f32.mrb[18].mxu0 }
 0x106   :  { %v2050_v37 = vand.u32 2147483647, %v223_v31  ;;  %v2052_v38 = vpop.f32.mrb[19].mxu0  ;;  %v410_v57 = vmul.f32 %v1660_v19, %v2044_v27  ;;  %v1666_v19 = vunpack.i.h.bf16 %v1664_v52  ;;  %v1669_v31 = vpop.permute.xlu0 %1668  ;;  %v294_v52 = vmax.f32 %v1986_v16, 0.0 }
 0x107   :  { %854 = vrot.lane.b32.xlu1 %v820_v33, %s1766_s21  ;;  %v1535_v33 = vunpack.i.l.bf16 %v1922_v59 }
 0x108   :  { %856 = vrot.lane.b32.xlu0 %v821_v39, %s1766_s21  ;;  %v411_v45 = vmul.f32 %v1661_v30, %v2050_v37  ;;  %v2064_v8 = vadd.f32 %v410_v57, %v2047_v28  ;;  %v278_v57 = vand.u32 2147483647, %v1986_v16  ;;  %v1671_v16 = vunpack.i.h.bf16 %v1669_v31 }
 0x10a   :  { %v2068_v13 = vadd.f32 %v411_v45, %v2052_v38  ;;  %v1670_v45 = vunpack.i.l.bf16 %v1669_v31 }
 0x10b   :  { %1032 = vrot.lane.b32.xlu1 %v277_v35, %s1765_s0  ;;  %v229_v53 = vpop.f32.mrb[20].mxu0 }
 0x10c   :  { %v2071_v14 = vand.u32 2147483647, %v229_v53  ;;  %538 = vrot.lane.b32.xlu0 %v502_v42, %s1765_s0  ;;  %v2074_v18 = vpop.f32.mrb[21].mxu0  ;;  %v822_v42 = vmul.f32 %v1535_v33, %v1983_v15  ;;  %v1604_v15 = vunpack.i.h.bf16 %v1944_v6  ;;  %v295_v33 = vmax.f32 %v1991_v24, 0.0 }
 0x10d   :  { %v233_v22 = vpop.f32.mrb[22].mxu0 }
 0x10e   :  { %v2078_v25 = vand.u32 2147483647, %v233_v22  ;;  %v2080_v26 = vpop.f32.mrb[23].mxu0  ;;  %v412_v30 = vmul.f32 %v1665_v43, %v2071_v14  ;;  %v1603_v43 = vunpack.i.l.bf16 %v1944_v6  ;;  %v279_v22 = vand.u32 2147483647, %v1991_v24 }
 0x10f   :  { %1137 = vrot.lane.b32.xlu1 %v1102_v2, %s1763_s15  ;;  %v1531_v24 = vunpack.i.h.bf16 %v1914_v55 }
 0x110   :  { %698 = vrot.lane.b32.xlu0 %v662_v44, %s1763_s15  ;;  %v413_v39 = vmul.f32 %v1666_v19, %v2078_v25  ;;  %v2090_v41 = vadd.f32 %v412_v30, %v2074_v18  ;;  %v1525_v19 = vunpack.i.h.bf16 %v1912_v54  ;;  %v1103_v30 = vmul.f32 %v1926_v61, %v294_v52  ;;  %v1674_v54 = vpop.permute.xlu1 %1673 }
 0x111   :  { %v663_v9 = vmul.f32 %v1531_v24, %v1989_v23 }
 0x112   :  { %v2094_v35 = vadd.f32 %v413_v39, %v2080_v26  ;;  %v503_v52 = vmul.f32 %v1525_v19, %v1989_v23  ;;  %v1676_v19 = vunpack.i.h.bf16 %v1674_v54 }
 0x113   :  { %1034 = vrot.lane.b32.xlu1 %v278_v57, %s1765_s0  ;;  %v239_v46 = vpop.f32.mrb[24].mxu0 }
 0x114   :  { %v2098_v53 = vand.u32 2147483647, %v239_v46  ;;  %858 = vrot.lane.b32.xlu0 %v822_v42, %s1766_s21  ;;  %v2101_v44 = vpop.f32.mrb[25].mxu0 }
 0x115   :  { %v243_v2 = vpop.f32.mrb[26].mxu0 }
 0x116   :  { %v2108_v39 = vand.u32 2147483647, %v243_v2  ;;  %v2110_v57 = vpop.f32.mrb[27].mxu0  ;;  %v414_v42 = vmul.f32 %v1670_v45, %v2098_v53  ;;  %v2114_v46 = vmul.f32 %v1603_v43, %v2098_v53  ;;  %v1104_v45 = vmul.f32 %v1926_v61, %v295_v33 }
 0x117   :  { %1139 = vrot.lane.b32.xlu1 %v1103_v30, %s1763_s15  ;;  %v1675_v43 = vunpack.i.l.bf16 %v1674_v54  ;;  %v296_v33 = vmax.f32 %v2012_v21, 0.0  ;;  %v1541_v54 = vunpack.i.l.bf16 %v1916_v56 }
 0x118   :  { %1036 = vrot.lane.b32.xlu0 %v279_v22, %s1765_s0  ;;  %v415_v6 = vmul.f32 %v1671_v16, %v2108_v39  ;;  %v2120_v31 = vmul.f32 %v1604_v15, %v2108_v39  ;;  %v2125_v2 = vadd.f32 %v414_v42, %v2101_v44  ;;  %v280_v16 = vand.u32 2147483647, %v2012_v21 }
 0x11a   :  { %2410 = vst [vmem:[#allocation6_spill] sm:$0xff] %v2125_v2  ;;  %v2129_v30 = vadd.f32 %v415_v6, %v2110_v57 }
 0x11b   :  { %540 = vrot.lane.b32.xlu1 %v503_v52, %s1765_s0  ;;  %v249_v22 = vpop.f32.mrb[28].mxu0 }
 0x11c   :  { %2411 = vst [vmem:[#allocation7_spill] sm:$0xff] %v2129_v30  ;;  %v2133_v15 = vand.u32 2147483647, %v249_v22  ;;  %1141 = vrot.lane.b32.xlu0 %v1104_v45, %s1763_s15  ;;  %v2136_v55 = vpop.f32.mrb[29].mxu0  ;;  %v1536_v30 = vunpack.i.h.bf16 %v1922_v59  ;;  %v1542_v22 = vunpack.i.h.bf16 %v1916_v56  ;;  %v504_v59 = vmul.f32 %v1541_v54, %v2009_v40 }
 0x11d   :  { %v253_v42 = vpop.f32.mrb[30].mxu0  ;;  %v1548_v56 = vunpack.i.h.bf16 %v1920_v58  ;;  %v1564_v54 = vunpack.i.l.bf16 %v1930_v63 }
 0x11e   :  { %v2140_v2 = vand.u32 2147483647, %v253_v42  ;;  %v2142_v6 = vpop.f32.mrb[31].mxu0  ;;  %v416_v52 = vmul.f32 %v1675_v43, %v2133_v15  ;;  %v823_v24 = vmul.f32 %v1536_v30, %v1989_v23  ;;  %v1105_v42 = vmul.f32 %v1926_v61, %v296_v33 }
 0x11f   :  { %700 = vrot.lane.b32.xlu1 %v663_v9, %s1763_s15  ;;  %v505_v9 = vmul.f32 %v1542_v22, %v2017_v47  ;;  %v1547_v23 = vunpack.i.l.bf16 %v1920_v58  ;;  %v281_v33 = vand.u32 2147483647, %v2019_v48  ;;  %v297_v58 = vmax.f32 %v2019_v48, 0.0 }
 0x120   :  { %1038 = vrot.lane.b32.xlu0 %v280_v16, %s1765_s0  ;;  %v417_v45 = vmul.f32 %v1676_v19, %v2140_v2  ;;  %v2152_v21 = vadd.f32 %v416_v52, %v2136_v55  ;;  %v825_v16 = vmul.f32 %v1548_v56, %v2017_v47  ;;  %v282_v19 = vand.u32 2147483647, %v2047_v28 }
 0x121   :  { %v824_v30 = vmul.f32 %v1547_v23, %v2009_v40  ;;  %v1553_v52 = vunpack.i.l.bf16 %v1924_v60  ;;  %v1106_v40 = vmul.f32 %v1926_v61, %v297_v58  ;;  %v1559_v47 = vunpack.i.l.bf16 %v1928_v62 }
 0x122   :  { %v2157_v43 = vadd.f32 %v417_v45, %v2142_v6  ;;  %v283_v48 = vand.u32 2147483647, %v2052_v38  ;;  %v1565_v56 = vunpack.i.h.bf16 %v1930_v63  ;;  %v1598_v58 = vunpack.i.l.bf16 %v1942_v5 }
 0x123   :  { %860 = vrot.lane.b32.xlu1 %v823_v24, %s1766_s21  ;;  %v666_v45 = vmul.f32 %v1559_v47, %v2044_v27  ;;  %v1560_v24 = vunpack.i.h.bf16 %v1928_v62  ;;  %v299_v62 = vmax.f32 %v2052_v38, 0.0  ;;  %v1582_v38 = vunpack.i.h.bf16 %v1934_v1 }
 0x124   :  { %1143 = vrot.lane.b32.xlu0 %v1105_v42, %s1763_s15  ;;  %v298_v42 = vmax.f32 %v2047_v28, 0.0  ;;  %v1577_v28 = vunpack.i.h.bf16 %v1938_v3  ;;  %v1581_v47 = vunpack.i.l.bf16 %v1934_v1 }
 0x125   :  { %v1108_v63 = vmul.f32 %v1926_v61, %v299_v62  ;;  %v1633_v62 = vunpack.i.h.bf16 %v1959_v34 }
 0x126   :  { %v1107_v23 = vmul.f32 %v1926_v61, %v298_v42 }
 0x127   :  { %542 = vrot.lane.b32.xlu1 %v504_v59, %s1765_s0  ;;  %v826_v59 = vmul.f32 %v1564_v54, %v2044_v27 }
 0x128   :  { %544 = vrot.lane.b32.xlu0 %v505_v9, %s1765_s0  ;;  %v1571_v9 = vunpack.i.h.bf16 %v1932_v0 }
 0x12b   :  { %702 = vrot.lane.b32.xlu1 %v2024_v11, %s1763_s15  ;;  %v506_v11 = vmul.f32 %v1553_v52, %v2044_v27  ;;  %v827_v27 = vmul.f32 %v1565_v56, %v2050_v37  ;;  %v829_v52 = vmul.f32 %v1582_v38, %v2078_v25  ;;  %v1627_v56 = vunpack.i.h.bf16 %v1948_v12 }
 0x12c   :  { %704 = vrot.lane.b32.xlu0 %v2030_v4, %s1763_s15  ;;  %v1554_v4 = vunpack.i.h.bf16 %v1924_v60  ;;  %v667_v60 = vmul.f32 %v1560_v24, %v2050_v37  ;;  %v1632_v24 = vunpack.i.l.bf16 %v1959_v34  ;;  %v284_v38 = vand.u32 2147483647, %v2074_v18 }
 0x12d   :  { %v300_v34 = vmax.f32 %v2074_v18, 0.0 }
 0x12e   :  { %v507_v22 = vmul.f32 %v1554_v4, %v2050_v37  ;;  %v1576_v37 = vunpack.i.l.bf16 %v1938_v3  ;;  %v1599_v3 = vunpack.i.h.bf16 %v1942_v5  ;;  %v1626_v5 = vunpack.i.l.bf16 %v1948_v12 }
 0x12f   :  { %862 = vrot.lane.b32.xlu1 %v824_v30, %s1766_s21  ;;  %v509_v30 = vmul.f32 %v1571_v9, %v2078_v25  ;;  %v1639_v12 = vunpack.i.h.bf16 %v1973_v49 }
 0x130   :  { %864 = vrot.lane.b32.xlu0 %v825_v16, %s1766_s21  ;;  %v1570_v16 = vunpack.i.l.bf16 %v1932_v0  ;;  %v668_v0 = vmul.f32 %v1576_v37, %v2071_v14  ;;  %v512_v42 = vmul.f32 %v1626_v5, %v2133_v15 }
 0x133   :  { %1040 = vrot.lane.b32.xlu1 %v281_v33, %s1765_s0  ;;  %v508_v33 = vmul.f32 %v1570_v16, %v2071_v14 }
 0x134   :  { %1042 = vrot.lane.b32.xlu0 %v282_v19, %s1765_s0  ;;  %v669_v19 = vmul.f32 %v1577_v28, %v2078_v25  ;;  %v1615_v25 = vunpack.i.l.bf16 %v1946_v7 }
 0x137   :  { %1145 = vrot.lane.b32.xlu1 %v1106_v40, %s1763_s15  ;;  %v510_v40 = vmul.f32 %v1598_v58, %v2098_v53 }
 0x138   :  { %546 = vrot.lane.b32.xlu0 %v506_v11, %s1765_s0  ;;  %v828_v11 = vmul.f32 %v1581_v47, %v2071_v14  ;;  %v1616_v14 = vunpack.i.h.bf16 %v1946_v7  ;;  %v1638_v7 = vunpack.i.l.bf16 %v1973_v49  ;;  %v833_v49 = vmul.f32 %v1639_v12, %v2140_v2 }
 0x139   :  { %v301_v47 = vmax.f32 %v2080_v26, 0.0 }
 0x13b   :  { %1044 = vrot.lane.b32.xlu1 %v283_v48, %s1765_s0  ;;  %v511_v48 = vmul.f32 %v1599_v3, %v2108_v39 }
 0x13c   :  { %706 = vrot.lane.b32.xlu0 %v666_v45, %s1763_s15  ;;  %v830_v45 = vmul.f32 %v1615_v25, %v2098_v53  ;;  %v302_v25 = vmax.f32 %v2101_v44, 0.0 }
 0x13f   :  { %548 = vrot.lane.b32.xlu1 %v507_v22, %s1765_s0 }
 0x140   :  { %866 = vrot.lane.b32.xlu0 %v826_v59, %s1766_s21 }
 0x143   :  { %708 = vrot.lane.b32.xlu1 %v667_v60, %s1763_s15  ;;  %v831_v60 = vmul.f32 %v1616_v14, %v2108_v39  ;;  %v513_v39 = vmul.f32 %v1627_v56, %v2140_v2  ;;  %v1111_v14 = vmul.f32 %v1926_v61, %v302_v25 }
 0x144   :  { %1147 = vrot.lane.b32.xlu0 %v1107_v23, %s1763_s15 }
 0x147   :  { %868 = vrot.lane.b32.xlu1 %v827_v27, %s1766_s21 }
 0x148   :  { %552 = vrot.lane.b32.xlu0 %v509_v30, %s1765_s0  ;;  %v832_v30 = vmul.f32 %v1638_v7, %v2133_v15  ;;  %v288_v7 = vand.u32 2147483647, %v2136_v55 }
 0x14b   :  { %1149 = vrot.lane.b32.xlu1 %v1108_v63, %s1763_s15 }
 0x14c   :  { %712 = vrot.lane.b32.xlu0 %v669_v19, %s1763_s15  ;;  %v673_v19 = vmul.f32 %v1633_v62, %v2140_v2 }
 0x14f   :  { %550 = vrot.lane.b32.xlu1 %v508_v33, %s1765_s0 }
 0x150   :  { %872 = vrot.lane.b32.xlu0 %v829_v52, %s1766_s21 }
 0x153   :  { %710 = vrot.lane.b32.xlu1 %v668_v0, %s1763_s15 }
 0x154   :  { %554 = vrot.lane.b32.xlu0 %v510_v40, %s1765_s0  ;;  %v1109_v40 = vmul.f32 %v1926_v61, %v300_v34 }
 0x157   :  { %870 = vrot.lane.b32.xlu1 %v828_v11, %s1766_s21  ;;  %v286_v11 = vand.u32 2147483647, %v2101_v44 }
 0x158   :  { %714 = vrot.lane.b32.xlu0 %v2114_v46, %s1763_s15 }
 0x159   :  { %v2233_v4 = vpop.permute.xlu1 %1026 }
 0x15a   :  { %v691_v1 = vpop.permute.xlu0 %690 }
 0x15b   :  { %556 = vrot.lane.b32.xlu1 %v511_v48, %s1765_s0 }
 0x15c   :  { %874 = vrot.lane.b32.xlu0 %v830_v45, %s1766_s21 }
 0x15d   :  { %v531_v54 = vpop.permute.xlu1 %530 }
 0x15e   :  { %v578_v46 = vadd.f32 %v531_v54, %v1954_v29  ;;  %v851_v22 = vpop.permute.xlu0 %850  ;;  %v672_v29 = vmul.f32 %v1632_v24, %v2133_v15 }
 0x15f   :  { %716 = vrot.lane.b32.xlu1 %v2120_v31, %s1763_s15 }
 0x160   :  { %v738_v53 = vadd.f32 %v691_v1, %v578_v46  ;;  %558 = vrot.lane.b32.xlu0 %v512_v42, %s1765_s0  ;;  %v1110_v1 = vmul.f32 %v1926_v61, %v301_v47  ;;  %v287_v46 = vand.u32 2147483647, %v2110_v57 }
 0x161   :  { %v2247_v59 = vpop.permute.xlu1 %1131 }
 0x162   :  { %v2251_v9 = vadd.f32 %v851_v22, %v738_v53  ;;  %v2253_v23 = vpop.permute.xlu0 %1028  ;;  %v303_v22 = vmax.f32 %v2110_v57, 0.0 }
 0x163   :  { %876 = vrot.lane.b32.xlu1 %v831_v60, %s1766_s21 }
 0x164   :  { %v930_v31 = vmin.f32 %v2251_v9, 0.0  ;;  %718 = vrot.lane.b32.xlu0 %v672_v29, %s1763_s15  ;;  %v304_v29 = vmax.f32 %v2136_v55, 0.0  ;;  %vm914_vm3 = vcmp.gt.f32.partialorder %v2251_v9, 0.0  ;;  %v1112_v62 = vmul.f32 %v1926_v61, %v303_v22 }
 0x165   :  { %v533_v27 = vpop.permute.xlu1 %532 }
 0x166   :  { %v2262_v28 = vpop.permute.xlu0 %1133  ;;  %v946_v16 = vmul.f32 1.442695, %v930_v31  ;;  %v579_v37 = vadd.f32 %v533_v27, %v1956_v32  ;;  %v285_v32 = vand.u32 2147483647, %v2080_v26 }
 0x167   :  { %560 = vrot.lane.b32.xlu1 %v513_v39, %s1765_s0 }
 0x168   :  { %878 = vrot.lane.b32.xlu0 %v832_v30, %s1766_s21  ;;  %1702 = vpow2.f32 %v946_v16  ;;  %v1113_v16 = vmul.f32 %v1926_v61, %v304_v29 }
 0x169   :  { %v693_v63 = vpop.permute.xlu1 %692 }
 0x16a   :  { %v2272_v33 = vpop.permute.xlu0 %1030  ;;  %v739_v15 = vadd.f32 %v693_v63, %v579_v37  ;;  %v305_v37 = vmax.f32 %v2142_v6, 0.0 }
 0x16b   :  { %720 = vrot.lane.b32.xlu1 %v673_v19, %s1763_s15 }
 0x16c   :  { %1046 = vrot.lane.b32.xlu0 %v284_v38, %s1765_s0  ;;  %v1769_v38 = vmov 0.0   ;;  %v1114_v47 = vmul.f32 %v1926_v61, %v305_v37 }
 0x16d   :  { %v853_v58 = vpop.permute.xlu1 %852  ;;  %1448 = vmatprep.mubr.msk.f32.mxu1 %vm1768_vm4, %v1769_v38 }
 0x16e   :  { %v899_v52 = vadd.f32 %v853_v58, %v739_v15  ;;  %v2277_v0 = vpop.permute.xlu0 %1135 }
 0x16f   :  { %880 = vrot.lane.b32.xlu1 %v833_v49, %s1766_s21 }
 0x170   :  { %v931_v18 = vmin.f32 %v899_v52, 0.0  ;;  %1151 = vrot.lane.b32.xlu0 %v1109_v40, %s1763_s15  ;;  %vm915_vm5 = vcmp.gt.f32.partialorder %v899_v52, 0.0 }
 0x171   :  { %v535_v3 = vpop.permute.xlu1 %534 }
 0x172   :  { %v948_v2 = vmul.f32 1.442695, %v931_v18  ;;  %v537_v48 = vpop.permute.xlu0 %536  ;;  %v1703_v5 = vpop.eup %1702  ;;  %v580_v26 = vadd.f32 %v535_v3, %v1975_v50 }
 0x173   :  { %1048 = vrot.lane.b32.xlu1 %v285_v32, %s1765_s0  ;;  %v581_v24 = vadd.f32 %v537_v48, %v1979_v10  ;;  %v1365_v42 = vadd.f32 -1.0, %v1703_v5 }
 0x174   :  { %1704 = vpow2.f32 %v948_v2  ;;  %1050 = vrot.lane.b32.xlu0 %v286_v11, %s1765_s0 }
 0x175   :  { %v695_v45 = vpop.permute.xlu1 %694  ;;  %v994_v57 = vsel %vm914_vm3, %v2251_v9, %v1365_v42  ;;  %v289_v9 = vand.u32 2147483647, %v2142_v6 }
 0x176   :  { %v697_v54 = vpop.permute.xlu0 %696  ;;  %v740_v44 = vadd.f32 %v695_v45, %v580_v26  ;;  %v1074_v34 = vmul.f32 %v2233_v4, %v994_v57 }
 0x177   :  { %1153 = vrot.lane.b32.xlu1 %v1110_v1, %s1763_s15  ;;  %v741_v53 = vadd.f32 %v697_v54, %v581_v24 }
 0x178   :  { %1155 = vrot.lane.b32.xlu0 %v1111_v14, %s1763_s15  ;;  %v1179_v18 = vadd.f32 %v2247_v59, %v1074_v34  ;;  %v2414_v59 = vmov 0.0|0.0  }
 0x179   :  { %v855_v60 = vpop.permute.xlu1 %854 }
 0x17a   :  { %v900_v50 = vadd.f32 %v855_v60, %v740_v44  ;;  %v857_v56 = vpop.permute.xlu0 %856 }
 0x17b   :  { %v901_v31 = vadd.f32 %v857_v56, %v741_v53  ;;  %1052 = vrot.lane.b32.xlu1 %v287_v46, %s1765_s0 }
 0x17c   :  { %v932_v10 = vmin.f32 %v900_v50, 0.0  ;;  %1054 = vrot.lane.b32.xlu0 %v288_v7, %s1765_s0  ;;  %vm916_vm8 = vcmp.gt.f32.partialorder %v900_v50, 0.0 }
 0x17d   :  { %v933_v27 = vmin.f32 %v901_v31, 0.0  ;;  %v1033_v39 = vpop.permute.xlu1 %1032  ;;  %vm917_vm9 = vcmp.gt.f32.partialorder %v901_v31, 0.0 }
 0x17e   :  { %v1705_v30 = vpop.eup %1704  ;;  %v950_v55 = vmul.f32 1.442695, %v932_v10  ;;  %v539_v12 = vpop.permute.xlu0 %538 }
 0x17f   :  { %v1366_v63 = vadd.f32 -1.0, %v1705_v30  ;;  %v952_v19 = vmul.f32 1.442695, %v933_v27  ;;  %1157 = vrot.lane.b32.xlu1 %v1112_v62, %s1763_s15  ;;  %v582_v4 = vadd.f32 %v539_v12, %v1999_v51 }
 0x180   :  { %1706 = vpow2.f32 %v950_v55  ;;  %1159 = vrot.lane.b32.xlu0 %v1113_v16, %s1763_s15 }
 0x181   :  { %v995_v15 = vsel %vm915_vm5, %v899_v52, %v1366_v63  ;;  %1708 = vpow2.f32 %v952_v19  ;;  %v1138_v58 = vpop.permute.xlu1 %1137 }
 0x182   :  { %v1075_v49 = vmul.f32 %v2253_v23, %v995_v15  ;;  %v699_v40 = vpop.permute.xlu0 %698  ;;  %v1196_v23 = vld [vmem:[#allocation2] sm:$0x1] }
 0x183   :  { %1056 = vrot.lane.b32.xlu1 %v289_v9, %s1765_s0  ;;  %v742_v52 = vadd.f32 %v699_v40, %v582_v4 }
 0x184   :  { %v1180_v32 = vadd.f32 %v2262_v28, %v1075_v49  ;;  %1199 = vperm.xlu0 %1677, %v1196_v23  }
 0x185   :  { %v2315_v3 = vpop.permute.xlu1 %1034 }
 0x186   :  { %v859_v11 = vpop.permute.xlu0 %858  ;;  %v1452_v25 = vpack.c.bf16 %v1180_v32, %v1179_v18 }
 0x187   :  { %1161 = vrot.lane.b32.xlu1 %v1114_v47, %s1763_s15  ;;  %v902_v51 = vadd.f32 %v859_v11, %v742_v52 }
 0x188   :  { %1454 = vmatpush3.bf16.xpose.msk.msra.mxu1 %vm2319_vm7, %v1452_v25 }
 0x189   :  { %v2326_v61 = vpop.permute.xlu1 %1139  ;;  %1455 = vmatprep.subr.bf16.mxu1 %v2414_v59  ;;  %v934_v5 = vmin.f32 %v902_v51, 0.0  ;;  %vm918_vm10 = vcmp.gt.f32.partialorder %v902_v51, 0.0 }
 0x18a   :  { %v1707_v28 = vpop.eup %1706  ;;  %v1037_v2 = vpop.permute.xlu0 %1036 }
 0x18b   :  { %v1709_v48 = vpop.eup %1708  ;;  %v1367_v1 = vadd.f32 -1.0, %v1707_v28  ;;  %v954_v42 = vmul.f32 1.442695, %v934_v5 }
 0x18c   :  { %v1368_v45 = vadd.f32 -1.0, %v1709_v48 }
 0x18d   :  { %v996_v14 = vsel %vm916_vm8, %v900_v50, %v1367_v1  ;;  %v541_v26 = vpop.permute.xlu1 %540  ;;  %1710 = vpow2.f32 %v954_v42 }
 0x18e   :  { %v1076_v54 = vmul.f32 %v2272_v33, %v996_v14  ;;  %v997_v24 = vsel %vm917_vm9, %v901_v31, %v1368_v45  ;;  %v1142_v44 = vpop.permute.xlu0 %1141  ;;  %v583_v7 = vadd.f32 %v541_v26, %v2004_v36 }
 0x18f   :  { %v1077_v46 = vmul.f32 %v1033_v39, %v997_v24 }
 0x190   :  { %v1181_v22 = vadd.f32 %v2277_v0, %v1076_v54 }
 0x191   :  { %v1182_v53 = vadd.f32 %v1138_v58, %v1077_v46  ;;  %v701_v60 = vpop.permute.xlu1 %700 }
 0x192   :  { %v2332_v29 = vpop.permute.xlu0 %1038  ;;  %v743_v10 = vadd.f32 %v701_v60, %v583_v7 }
 0x193   :  { %v1456_v56 = vpack.c.bf16 %v1182_v53, %v1181_v22 }
 0x195   :  { %1458 = vmatpush3.bf16.xpose.msk.msra.mxu1 %vm2319_vm7, %v1456_v56  ;;  %v861_v50 = vpop.permute.xlu1 %860 }
 0x196   :  { %v903_v33 = vadd.f32 %v861_v50, %v743_v10  ;;  %v2336_v31 = vpop.permute.xlu0 %1143  ;;  %1459 = vmatprep.subr.bf16.mxu1 %v2414_v59 }
 0x197   :  { %v1711_v39 = vpop.eup %1710 }
 0x198   :  { %v935_v0 = vmin.f32 %v903_v33, 0.0  ;;  %v1369_v63 = vadd.f32 -1.0, %v1711_v39  ;;  %vm919_vm11 = vcmp.gt.f32.partialorder %v903_v33, 0.0 }
 0x199   :  { %v543_v62 = vpop.permute.xlu1 %542 }
 0x19a   :  { %v956_v57 = vmul.f32 1.442695, %v935_v0  ;;  %v545_v27 = vpop.permute.xlu0 %544  ;;  %v584_v30 = vadd.f32 %v543_v62, %v2034_v17  ;;  %v998_v58 = vsel %vm918_vm10, %v902_v51, %v1369_v63 }
 0x19b   :  { %v585_v55 = vadd.f32 %v545_v27, %v2038_v20  ;;  %v1078_v20 = vmul.f32 %v2315_v3, %v998_v58 }
 0x19c   :  { %1712 = vpow2.f32 %v956_v57 }
 0x19d   :  { %v703_v36 = vpop.permute.xlu1 %702  ;;  %v1183_v28 = vadd.f32 %v2326_v61, %v1078_v20 }
 0x19e   :  { %v705_v16 = vpop.permute.xlu0 %704  ;;  %v744_v12 = vadd.f32 %v703_v36, %v584_v30 }
 0x19f   :  { %v745_v19 = vadd.f32 %v705_v16, %v585_v55 }
 0x1a1   :  { %v863_v38 = vpop.permute.xlu1 %862 }
 0x1a2   :  { %v904_v34 = vadd.f32 %v863_v38, %v744_v12  ;;  %v865_v9 = vpop.permute.xlu0 %864 }
 0x1a3   :  { %v905_v37 = vadd.f32 %v865_v9, %v745_v19 }
 0x1a4   :  { %v936_v15 = vmin.f32 %v904_v34, 0.0  ;;  %vm920_vm12 = vcmp.gt.f32.partialorder %v904_v34, 0.0 }
 0x1a5   :  { %v937_v49 = vmin.f32 %v905_v37, 0.0  ;;  %v1041_v40 = vpop.permute.xlu1 %1040  ;;  %vm921_vm13 = vcmp.gt.f32.partialorder %v905_v37, 0.0 }
 0x1a6   :  { %v1713_v18 = vpop.eup %1712  ;;  %v958_v4 = vmul.f32 1.442695, %v936_v15  ;;  %v2341_v32 = vpop.permute.xlu0 %1042 }
 0x1a7   :  { %v1370_v17 = vadd.f32 -1.0, %v1713_v18  ;;  %v960_v47 = vmul.f32 1.442695, %v937_v49 }
 0x1a8   :  { %1714 = vpow2.f32 %v958_v4 }
 0x1a9   :  { %v999_v23 = vsel %vm919_vm11, %v903_v33, %v1370_v17  ;;  %1716 = vpow2.f32 %v960_v47  ;;  %v1146_v52 = vpop.permute.xlu1 %1145 }
 0x1aa   :  { %v1079_v11 = vmul.f32 %v1037_v2, %v999_v23  ;;  %v547_v25 = vpop.permute.xlu0 %546 }
 0x1ab   :  { %v586_v5 = vadd.f32 %v547_v25, %v2064_v8 }
 0x1ac   :  { %v1184_v51 = vadd.f32 %v1142_v44, %v1079_v11 }
 0x1ad   :  { %v2345_v48 = vpop.permute.xlu1 %1044 }
 0x1ae   :  { %v707_v1 = vpop.permute.xlu0 %706  ;;  %v1460_v45 = vpack.c.bf16 %v1184_v51, %v1183_v28 }
 0x1af   :  { %v746_v3 = vadd.f32 %v707_v1, %v586_v5 }
 0x1b0   :  { %1462 = vmatpush3.bf16.xpose.msk.msra.mxu1 %vm2319_vm7, %v1460_v45 }
 0x1b1   :  { %v549_v14 = vpop.permute.xlu1 %548  ;;  %1463 = vmatprep.subr.bf16.mxu1 %v2414_v59 }
 0x1b2   :  { %v1715_v26 = vpop.eup %1714  ;;  %v867_v54 = vpop.permute.xlu0 %866  ;;  %v587_v60 = vadd.f32 %v549_v14, %v2068_v13 }
 0x1b3   :  { %v1717_v2 = vpop.eup %1716  ;;  %v1371_v24 = vadd.f32 -1.0, %v1715_v26  ;;  %v906_v46 = vadd.f32 %v867_v54, %v746_v3  ;;  %v2416_v54 = vld [vmem:[#allocation7_spill] sm:$0xff] }
 0x1b4   :  { %v1372_v61 = vadd.f32 -1.0, %v1717_v2 }
 0x1b5   :  { %v1000_v44 = vsel %vm920_vm12, %v904_v34, %v1371_v24  ;;  %v938_v22 = vmin.f32 %v906_v46, 0.0  ;;  %v709_v42 = vpop.permute.xlu1 %708  ;;  %vm922_vm14 = vcmp.gt.f32.partialorder %v906_v46, 0.0 }
 0x1b6   :  { %v1080_v8 = vmul.f32 %v2332_v29, %v1000_v44  ;;  %v1001_v53 = vsel %vm921_vm13, %v905_v37, %v1372_v61  ;;  %v1148_v7 = vpop.permute.xlu0 %1147  ;;  %v747_v33 = vadd.f32 %v709_v42, %v587_v60 }
 0x1b7   :  { %v1081_v56 = vmul.f32 %v1041_v40, %v1001_v53  ;;  %v962_v10 = vmul.f32 1.442695, %v938_v22 }
 0x1b8   :  { %v1185_v50 = vadd.f32 %v2336_v31, %v1080_v8 }
 0x1b9   :  { %v1186_v0 = vadd.f32 %v1146_v52, %v1081_v56  ;;  %1718 = vpow2.f32 %v962_v10  ;;  %v869_v62 = vpop.permute.xlu1 %868 }
 0x1ba   :  { %v907_v57 = vadd.f32 %v869_v62, %v747_v33  ;;  %v553_v27 = vpop.permute.xlu0 %552 }
 0x1bb   :  { %v1464_v36 = vpack.c.bf16 %v1186_v0, %v1185_v50  ;;  %v589_v19 = vadd.f32 %v553_v27, %v2094_v35  ;;  %v2415_v35 = vld [vmem:[#allocation6_spill] sm:$0xff] }
 0x1bc   :  { %v939_v39 = vmin.f32 %v907_v57, 0.0  ;;  %vm923_vm15 = vcmp.gt.f32.partialorder %v907_v57, 0.0 }
 0x1bd   :  { %1466 = vmatpush3.bf16.xpose.msk.msra.mxu1 %vm2319_vm7, %v1464_v36  ;;  %v1150_v29 = vpop.permute.xlu1 %1149 }
 0x1be   :  { %v964_v30 = vmul.f32 1.442695, %v939_v39  ;;  %v713_v16 = vpop.permute.xlu0 %712  ;;  %1467 = vmatprep.subr.bf16.mxu1 %v2414_v59 }
 0x1bf   :  { %v749_v9 = vadd.f32 %v713_v16, %v589_v19 }
 0x1c0   :  { %1720 = vpow2.f32 %v964_v30 }
 0x1c1   :  { %v551_v13 = vpop.permute.xlu1 %550 }
 0x1c2   :  { %v873_v55 = vpop.permute.xlu0 %872  ;;  %v588_v38 = vadd.f32 %v551_v13, %v2090_v41 }
 0x1c3   :  { %v1719_v31 = vpop.eup %1718  ;;  %v2359_v40 = vadd.f32 %v873_v55, %v749_v9 }
 0x1c4   :  { %v1373_v12 = vadd.f32 -1.0, %v1719_v31 }
 0x1c5   :  { %v711_v63 = vpop.permute.xlu1 %710  ;;  %v941_v25 = vmin.f32 %v2359_v40, 0.0  ;;  %vm925_vm1 = vcmp.gt.f32.partialorder %v2359_v40, 0.0 }
 0x1c6   :  { %v555_v34 = vpop.permute.xlu0 %554  ;;  %v748_v37 = vadd.f32 %v711_v63, %v588_v38  ;;  %v1002_v15 = vsel %vm922_vm14, %v906_v46, %v1373_v12 }
 0x1c7   :  { %v1082_v47 = vmul.f32 %v2341_v32, %v1002_v15  ;;  %v590_v52 = vadd.f32 %v555_v34, %v2415_v35  ;;  %v968_v32 = vmul.f32 1.442695, %v941_v25 }
 0x1c9   :  { %v871_v58 = vpop.permute.xlu1 %870  ;;  %v1187_v1 = vadd.f32 %v1148_v7, %v1082_v47 }
 0x1ca   :  { %v1721_v49 = vpop.eup %1720  ;;  %v908_v18 = vadd.f32 %v871_v58, %v748_v37  ;;  %v715_v4 = vpop.permute.xlu0 %714 }
 0x1cb   :  { %v1374_v17 = vadd.f32 -1.0, %v1721_v49  ;;  %v750_v51 = vadd.f32 %v715_v4, %v590_v52 }
 0x1cc   :  { %v940_v20 = vmin.f32 %v908_v18, 0.0  ;;  %vm924_vm0 = vcmp.gt.f32.partialorder %v908_v18, 0.0 }
 0x1cd   :  { %v1003_v23 = vsel %vm923_vm15, %v907_v57, %v1374_v17  ;;  %v557_v41 = vpop.permute.xlu1 %556 }
 0x1ce   :  { %v1083_v11 = vmul.f32 %v2345_v48, %v1003_v23  ;;  %v875_v28 = vpop.permute.xlu0 %874  ;;  %v966_v5 = vmul.f32 1.442695, %v940_v20  ;;  %v591_v2 = vadd.f32 %v557_v41, %v2416_v54 }
 0x1cf   :  { %v2365_v3 = vadd.f32 %v875_v28, %v750_v51 }
 0x1d0   :  { %v1188_v45 = vadd.f32 %v1150_v29, %v1083_v11  ;;  %1722 = vpow2.f32 %v966_v5 }
 0x1d1   :  { %v717_v14 = vpop.permute.xlu1 %716  ;;  %v942_v48 = vmin.f32 %v2365_v3, 0.0  ;;  %1724 = vpow2.f32 %v968_v32  ;;  %vm926_vm2 = vcmp.gt.f32.partialorder %v2365_v3, 0.0 }
 0x1d2   :  { %v1468_v26 = vpack.c.bf16 %v1188_v45, %v1187_v1  ;;  %v559_v24 = vpop.permute.xlu0 %558  ;;  %v751_v46 = vadd.f32 %v717_v14, %v591_v2 }
 0x1d3   :  { %v592_v42 = vadd.f32 %v559_v24, %v2152_v21  ;;  %v970_v53 = vmul.f32 1.442695, %v942_v48 }
 0x1d4   :  { %1470 = vmatpush3.bf16.xpose.msk.msra.mxu1 %vm2319_vm7, %v1468_v26 }
 0x1d5   :  { %v877_v61 = vpop.permute.xlu1 %876  ;;  %1471 = vmatprep.subr.bf16.mxu1 %v2414_v59  ;;  %1726 = vpow2.f32 %v970_v53 }
 0x1d6   :  { %v911_v44 = vadd.f32 %v877_v61, %v751_v46  ;;  %v719_v22 = vpop.permute.xlu0 %718 }
 0x1d7   :  { %v752_v60 = vadd.f32 %v719_v22, %v592_v42  ;;  %v1195_v42 = vld [vmem:[%s2404_s2] sm:$0x1] }
 0x1d8   :  { %v943_v8 = vmin.f32 %v911_v44, 0.0  ;;  %vm927_vm3 = vcmp.gt.f32.partialorder %v911_v44, 0.0 }
 0x1d9   :  { %v561_v7 = vpop.permute.xlu1 %560 }
 0x1da   :  { %v972_v56 = vmul.f32 1.442695, %v943_v8  ;;  %v879_v10 = vpop.permute.xlu0 %878  ;;  %v1723_v62 = vpop.eup %1722  ;;  %v593_v57 = vadd.f32 %v561_v7, %v2157_v43  ;;  %v1202_v8 = vlaneseq }
 0x1db   :  { %v912_v50 = vadd.f32 %v879_v10, %v752_v60  ;;  %v1725_v36 = vpop.eup %1724  ;;  %v1375_v30 = vadd.f32 -1.0, %v1723_v62 }
 0x1dc   :  { %1728 = vpow2.f32 %v972_v56  ;;  %v1376_v55 = vadd.f32 -1.0, %v1725_v36  ;;  %v1203_v53 = vshrl.u32 %v1202_v8, 7 }
 0x1dd   :  { %v944_v33 = vmin.f32 %v912_v50, 0.0  ;;  %v721_v0 = vpop.permute.xlu1 %720  ;;  %v1004_v12 = vsel %vm924_vm0, %v908_v18, %v1375_v30  ;;  %vm928_vm4 = vcmp.gt.f32.partialorder %v912_v50, 0.0 }
 0x1de   :  { %v1047_v27 = vpop.permute.xlu0 %1046  ;;  %v753_v29 = vadd.f32 %v721_v0, %v593_v57  ;;  %v1005_v43 = vsel %vm925_vm1, %v2359_v40, %v1376_v55  ;;  %v1204_v60 = vsub.s32 0, %v1203_v53 }
 0x1df   :  { %v974_v39 = vmul.f32 1.442695, %v944_v33  ;;  %v1727_v34 = vpop.eup %1726  ;;  %v1084_v37 = vmul.f32 %v1047_v27, %v1004_v12 }
 0x1e0   :  { %v1377_v17 = vadd.f32 -1.0, %v1727_v34 }
 0x1e1   :  { %v881_v21 = vpop.permute.xlu1 %880  ;;  %1730 = vpow2.f32 %v974_v39 }
 0x1e2   :  { %v913_v16 = vadd.f32 %v881_v21, %v753_v29  ;;  %v1152_v13 = vpop.permute.xlu0 %1151  ;;  %v1006_v40 = vsel %vm926_vm2, %v2365_v3, %v1377_v17 }
 0x1e3   :  { %v1189_v49 = vadd.f32 %v1152_v13, %v1084_v37 }
 0x1e4   :  { %v945_v31 = vmin.f32 %v913_v16, 0.0  ;;  %vm929_vm5 = vcmp.gt.f32.partialorder %v913_v16, 0.0 }
 0x1e5   :  { %v1049_v63 = vpop.permute.xlu1 %1048 }
 0x1e6   :  { %v976_v19 = vmul.f32 1.442695, %v945_v31  ;;  %v1051_v38 = vpop.permute.xlu0 %1050  ;;  %v1729_v9 = vpop.eup %1728  ;;  %v1085_v15 = vmul.f32 %v1049_v63, %v1005_v43 }
 0x1e7   :  { %v1378_v20 = vadd.f32 -1.0, %v1729_v9  ;;  %v1086_v41 = vmul.f32 %v1051_v38, %v1006_v40 }
 0x1e8   :  { %1732 = vpow2.f32 %v976_v19 }
 0x1e9   :  { %v1154_v58 = vpop.permute.xlu1 %1153  ;;  %v1007_v52 = vsel %vm927_vm3, %v911_v44, %v1378_v20 }
 0x1ea   :  { %v1190_v4 = vadd.f32 %v1154_v58, %v1085_v15  ;;  %v1156_v47 = vpop.permute.xlu0 %1155 }
 0x1eb   :  { %v1731_v35 = vpop.eup %1730  ;;  %v1191_v45 = vadd.f32 %v1156_v47, %v1086_v41 }
 0x1ec   :  { %v1472_v23 = vpack.c.bf16 %v1190_v4, %v1189_v49  ;;  %v1379_v25 = vadd.f32 -1.0, %v1731_v35 }
 0x1ed   :  { %v1053_v18 = vpop.permute.xlu1 %1052 }
 0x1ee   :  { %1474 = vmatpush3.bf16.xpose.msk.msra.mxu1 %vm2319_vm7, %v1472_v23  ;;  %v1087_v11 = vmul.f32 %v1053_v18, %v1007_v52  ;;  %v1055_v28 = vpop.permute.xlu0 %1054  ;;  %v1008_v32 = vsel %vm928_vm4, %v912_v50, %v1379_v25 }
 0x1ef   :  { %1475 = vmatprep.subr.bf16.mxu1 %v2414_v59  ;;  %v1088_v24 = vmul.f32 %v1055_v28, %v1008_v32 }
 0x1f1   :  { %v1158_v51 = vpop.permute.xlu1 %1157 }
 0x1f2   :  { %v1733_v1 = vpop.eup %1732  ;;  %v1192_v5 = vadd.f32 %v1158_v51, %v1087_v11  ;;  %v1160_v3 = vpop.permute.xlu0 %1159 }
 0x1f3   :  { %v1380_v14 = vadd.f32 -1.0, %v1733_v1  ;;  %v1193_v61 = vadd.f32 %v1160_v3, %v1088_v24 }
 0x1f4   :  { %v1476_v26 = vpack.c.bf16 %v1192_v5, %v1191_v45 }
 0x1f5   :  { %v1009_v54 = vsel %vm929_vm5, %v913_v16, %v1380_v14  ;;  %v1057_v2 = vpop.permute.xlu1 %1056 }
 0x1f6   :  { %1478 = vmatpush3.bf16.xpose.msk.msra.mxu1 %vm2319_vm7, %v1476_v26  ;;  %v1089_v46 = vmul.f32 %v1057_v2, %v1009_v54 }
 0x1f7   :  { %1479 = vmatprep.subr.bf16.mxu1 %v2414_v59 }
 0x1f9   :  { %v1162_v48 = vpop.permute.xlu1 %1161 }
 0x1fa   :  { %v1194_v44 = vadd.f32 %v1162_v48, %v1089_v46 }
 0x1fc   :  { %v1480_v22 = vpack.c.bf16 %v1194_v44, %v1193_v61 }
 0x1fe   :  { %1482 = vmatpush3.bf16.xpose.msk.msra.mxu1 %vm2319_vm7, %v1480_v22 }
 0x203   :  { %v1200_v7 = vpop.permute.xlu0 %1199 }
 0x204   :  { %v1205_v59 = vrot.slane %v1200_v7, %v1204_v60 }
 0x205   :  { %1449 = vmatmul.mubr.msk.f32.vlgmr.msra.gmra.mrb[0].mxu1 %vm1206_vm6, %v1195_v42 }
 0x2d8   :  { %v1324_v56 = vpop.f32.mrb[0].mxu1 }
 0x2d9   :  { %v1325_v10 = vadd.f32 %v1324_v56, %v1205_v59  ;;  %v1450_v50 = vpop.f32.mrb[1].mxu1 }
 0x2db   :  { %1328 = vst [vmem:[#allocation3] sm:$0x1] %v1325_v10 }
 0x2dc   :  { %1745 = shalt.err (!%p1742_p4)
}
 0x2dd   :  { %s1746_s28 = scalar_lea.hbm %s2407_s5, 16 }
 0x2de   :  { %p1747_p5 = scmp.ne.s32.totalorder %s2407_s5, %s1746_s28  ;;  %p1750_p6 = scmp.lt.u32.totalorder %s1746_s28, %s2407_s5 }
 0x2e0   :  { %p1752_p7 = pnand %p1750_p6, %p1747_p5 }
 0x2e2   :  { %1755 = shalt.err (!%p1752_p7)
}
 0x2e3   :  { %1338 = dma.vmem_to_hbm [thread:$0]  %s1336_s25, 16, %s2407_s5, [#allocation4]  }
 0x2e4   :  { %1756 = dma.done.wait [#allocation4], 16  }
 0x2e5   :  { %1757 = vsyncadd [#allocation4], 4294967280 }
 0x2e6   :  { %1342 = vsyncpa [#allocation4], 1 }

</bundles_post_ra>
